<compile_context>
chip_gen: v5e
topology: v5e:2x2
jax: 0.10.0
libtpu: 0.0.40
codegen_flags: <defaults>
</compile_context>

<pallas_src>
import functools

import jax
import jax.numpy as jnp
from jax.experimental import pallas as pl
from jax.experimental.pallas import tpu as pltpu


# ---------------------------------------------------------------------------
# Tiling / sizing heuristics
# ---------------------------------------------------------------------------

_DEFAULT_ROW_TILE = 2048                 # requested rows per grid step
_SMALL_INPUT_BYPASS_BYTES = 2 << 20      # below this, plain jnp.concatenate wins
_FALLBACK_VMEM_LIMIT = 32 * 1024 * 1024  # used when get_tpu_info() is unavailable

_MIN_SUBLANE_BY_ITEMSIZE = {4: 8, 2: 16, 1: 32}


def _min_sublane(dtype) -> int:
    return _MIN_SUBLANE_BY_ITEMSIZE.get(jnp.dtype(dtype).itemsize, 8)


def _lane_pad(width: int) -> int:
    return ((width + 127) // 128) * 128


def _round_up(x: int, m: int) -> int:
    return ((x + m - 1) // m) * m


@functools.lru_cache(maxsize=None)
def _vmem_limits() -> tuple[int, int]:
    """(scoped vmem_limit_bytes, working-set budget) for the current TPU gen."""
    try:
        cap = int(pltpu.get_tpu_info().vmem_capacity_bytes)
        # Half of physical VMEM, capped at 64 MiB: 64 MiB on 128 MiB parts
        # (v5e/v6e), 32 MiB on v7x's 64 MiB per-TC VMEM.
        limit = min(64 << 20, max(16 << 20, cap // 2))
    except Exception:
        limit = _FALLBACK_VMEM_LIMIT
    budget = (limit * 3) // 4            # headroom under the scoped limit
    return limit, budget


def _pick_row_tile(n_atoms: int, feat: int, k: int, dtype, requested: int) -> int:
    """Largest legal row tile that (a) fits the double-buffered working set in
    the generation-aware VMEM budget and (b) leaves >= 2 grid steps whenever
    possible so the 'parallel' atom axis shards across both v7x TensorCores."""
    min_rows = _min_sublane(dtype)
    itemsize = jnp.dtype(dtype).itemsize
    _, budget = _vmem_limits()
    # Double-buffered, lane-padded VMEM bytes per tile row (x + v + out blocks).
    per_row = 2 * itemsize * (_lane_pad(feat) + _lane_pad(k) + _lane_pad(feat + k))
    budget_rows = max(min_rows, budget // per_row)
    tile = max(min_rows, min(int(requested), int(budget_rows)))

    # Megacore: cap at ceil(N/2) (rounded up to the sublane minimum) so the grid
    # has >= 2 steps; harmless on single-TC chips, ~2x on v7x for mid-size N.
    if n_atoms > min_rows:
        half = _round_up((n_atoms + 1) // 2, min_rows)
        tile = min(tile, half)

    tile = (tile // min_rows) * min_rows               # legal sublane multiple
    tile = min(tile, _round_up(n_atoms, min_rows))     # never taller than padded array
    return max(tile, min_rows)


# ---------------------------------------------------------------------------
# Kernels
# ---------------------------------------------------------------------------

def _fused_concat_kernel(x_ref, v_ref, o_ref):
    # Build the full (TM, F+K) tile in registers and write it with a single
    # store stream (vst is the scarce slot; avoids two dependent masked stores
    # into the same output vreg lanes).
    o_ref[...] = jnp.concatenate([x_ref[...], v_ref[...]], axis=-1)


def _make_two_store_kernel(feat_width: int):
    # Fallback: two lane-slice stores (always lowers; slightly more vst traffic).
    def kernel(x_ref, v_ref, o_ref):
        o_ref[:, :feat_width] = x_ref[...]
        o_ref[:, feat_width:] = v_ref[...]
    return kernel


def _build_call(kernel, n_atoms: int, feat: int, k: int, dtype, row_tile: int):
    vmem_limit, _ = _vmem_limits()
    itemsize = jnp.dtype(dtype).itemsize
    grid = (pl.cdiv(n_atoms, row_tile),)
    return pl.pallas_call(
        kernel,
        out_shape=jax.ShapeDtypeStruct((n_atoms, feat + k), dtype),
        grid_spec=pltpu.PrefetchScalarGridSpec(
            num_scalar_prefetch=0,
            grid=grid,
            in_specs=[
                pl.BlockSpec((row_tile, feat), lambda i: (i, 0)),
                pl.BlockSpec((row_tile, k), lambda i: (i, 0)),
            ],
            out_specs=pl.BlockSpec((row_tile, feat + k), lambda i: (i, 0)),
        ),
        compiler_params=pltpu.CompilerParams(
            dimension_semantics=("parallel",),
            vmem_limit_bytes=vmem_limit,
        ),
        cost_estimate=pl.CostEstimate(
            flops=0,
            transcendentals=0,
            bytes_accessed=2 * n_atoms * (feat + k) * itemsize,
        ),
    )


@functools.lru_cache(maxsize=None)
def _fused_concat_supported(feat: int, k: int, dtype_name: str) -> bool:
    """One-time static probe: does the fused lane-axis concat lower & compile
    for this (F, K, dtype)?  Decided once per process, not per call."""
    dtype = jnp.dtype(dtype_name)
    rows = _min_sublane(dtype)
    try:
        call = _build_call(_fused_concat_kernel, rows, feat, k, dtype, rows)
        x_sds = jax.ShapeDtypeStruct((rows, feat), dtype)
        v_sds = jax.ShapeDtypeStruct((rows, k), dtype)
        jax.jit(call).lower(x_sds, v_sds).compile()
        return True
    except Exception:
        return False


# ---------------------------------------------------------------------------
# Public wrapper (== AddPerAtomValue.forward with the per-atom value already
# extracted from `data` on the host side — the getattr(data, key) lookup is
# host-side Python, not kernel work)
# ---------------------------------------------------------------------------

def add_per_atom_value(per_atom_property_tensor: jax.Array,
                       values_to_append: jax.Array,
                       *,
                       row_tile: int = _DEFAULT_ROW_TILE,
                       min_bytes_for_pallas: int = _SMALL_INPUT_BYPASS_BYTES) -> jax.Array:
    """Pallas equivalent of torch.cat((per_atom_property_tensor, values), dim=1)."""
    x = per_atom_property_tensor
    v = values_to_append
    if v.ndim == 1:
        v = v[:, None]
    assert x.ndim == 2 and v.ndim == 2, "expected 2-D (atoms, features) inputs"
    assert x.shape[0] == v.shape[0], "atom-axis mismatch"

    # torch.cat-style dtype promotion.
    dtype = jnp.promote_types(x.dtype, v.dtype)
    x = x.astype(dtype)
    v = v.astype(dtype)

    n_atoms, feat = x.shape
    k = v.shape[1]
    out_bytes = n_atoms * (feat + k) * jnp.dtype(dtype).itemsize

    # Small-input bypass: let XLA fuse the concat into its neighbours rather
    # than paying the custom-call fusion barrier + launch overhead.
    if out_bytes < min_bytes_for_pallas:
        return jnp.concatenate((x, v), axis=1)

    tile = _pick_row_tile(n_atoms, feat, k, dtype, row_tile)
    if _fused_concat_supported(feat, k, jnp.dtype(dtype).name):
        kernel = _fused_concat_kernel
    else:
        # TODO(synk): drop this fallback once unaligned lane-dim concatenate is
        # guaranteed by the installed Mosaic build.
        kernel = _make_two_store_kernel(feat)
    return _build_call(kernel, n_atoms, feat, k, dtype, tile)(x, v)


# ---------------------------------------------------------------------------
# Self-test
# ---------------------------------------------------------------------------

if __name__ == "__main__":
    key = jax.random.PRNGKey(0)
    k1, k2, k3, k4 = jax.random.split(key, 4)

    # Shapes consistent with the module's forward:
    #   per_atom_property_tensor: (num_atoms, num_features), appended value: (num_atoms, 1)
    num_atoms, num_features, append_width = 16, 32, 1
    x = jax.random.normal(k1, (num_atoms, num_features), dtype=jnp.float32)
    v = jax.random.normal(k2, (num_atoms, append_width), dtype=jnp.float32)

    # Force the Pallas path (the default bypass would route these small shapes
    # to plain jnp.concatenate).
    out = jax.block_until_ready(add_per_atom_value(x, v, min_bytes_for_pallas=0))
    ref = jnp.concatenate((x, v), axis=1)
    assert out.shape == (num_atoms, num_features + append_width)
    assert out.dtype == x.dtype
    assert jnp.array_equal(out, ref)

    # Atom count NOT a multiple of the tile: exercises the cdiv grid, the
    # megacore >=2-step clamp, and the masked tail tile.
    n2 = 77
    x2 = jax.random.normal(k3, (n2, num_features), dtype=jnp.float32)
    v2 = jax.random.normal(k4, (n2, append_width), dtype=jnp.float32)
    out2 = jax.block_until_ready(
        add_per_atom_value(x2, v2, row_tile=32, min_bytes_for_pallas=0))
    ref2 = jnp.concatenate((x2, v2), axis=1)
    assert out2.shape == (n2, num_features + append_width)
    assert jnp.array_equal(out2, ref2)

    # Default path for small inputs: XLA-fused concatenate bypass.
    out3 = jax.block_until_ready(add_per_atom_value(x, v))
    assert jnp.array_equal(out3, ref)

    print("KERNEL_OK")
</pallas_src>

<mosaic_0001>
module attributes {stable_mosaic.version = 11 : i64} {
  func.func @kernel(%arg0: i32, %arg1: memref<8x32xf32, #tpu.memory_space<vmem>>, %arg2: memref<8x1xf32, #tpu.memory_space<vmem>>, %arg3: memref<8x33xf32, #tpu.memory_space<vmem>>) attributes {dimension_semantics = [#tpu.dimension_semantics<parallel>], iteration_bounds = array<i64: 2>, scalar_prefetch = 0 : i64, scratch_operands = 0 : i64, tpu.core_type = #tpu.core_type<tc>, window_params = [{transform_indices = @transform_0, window_bounds = array<i64: 8, 32>}, {transform_indices = @transform_1, window_bounds = array<i64: 8, 1>}, {transform_indices = @transform_2, window_bounds = array<i64: 8, 33>}]} {
    %c0 = arith.constant 0 : index
    %c0_0 = arith.constant 0 : index
    %0 = vector.load %arg1[%c0, %c0_0] : memref<8x32xf32, #tpu.memory_space<vmem>>, vector<8x32xf32>
    %c0_1 = arith.constant 0 : index
    %c0_2 = arith.constant 0 : index
    %1 = vector.load %arg3[%c0_1, %c0_2] : memref<8x33xf32, #tpu.memory_space<vmem>>, vector<8x32xf32>
    tpu.vector_store %arg3[%c0_1, %c0_2], %0 {strides = array<i32>} : memref<8x33xf32, #tpu.memory_space<vmem>>, vector<8x32xf32>,
    %c0_3 = arith.constant 0 : index
    %c0_4 = arith.constant 0 : index
    %2 = vector.load %arg2[%c0_3, %c0_4] : memref<8x1xf32, #tpu.memory_space<vmem>>, vector<8x1xf32>
    %c0_5 = arith.constant 0 : index
    %c32 = arith.constant 32 : index
    %3 = vector.load %arg3[%c0_5, %c32] : memref<8x33xf32, #tpu.memory_space<vmem>>, vector<8x1xf32>
    tpu.vector_store %arg3[%c0_5, %c32], %2 {strides = array<i32>} : memref<8x33xf32, #tpu.memory_space<vmem>>, vector<8x1xf32>,
    return
  }
  func.func @transform_0(%arg0: i32) -> (i32, i32) {
    %c0_i32 = arith.constant 0 : i32
    %c0_i32_0 = arith.constant 0 : i32
    return %arg0, %c0_i32 : i32, i32
  }
  func.func @transform_1(%arg0: i32) -> (i32, i32) {
    %c0_i32 = arith.constant 0 : i32
    %c0_i32_0 = arith.constant 0 : i32
    return %arg0, %c0_i32 : i32, i32
  }
  func.func @transform_2(%arg0: i32) -> (i32, i32) {
    %c0_i32 = arith.constant 0 : i32
    %c0_i32_0 = arith.constant 0 : i32
    return %arg0, %c0_i32 : i32, i32
  }
}

</mosaic_0001>

<bundles_post_ra>
// kernel: tpu_custom_call.1
= control target key start
LH: loop header
LB: loop body
LE: loop exit
PB: predicated region body
PF: predicated region fallthrough
CT: control target
= control target key end

     0   :  { %7 = vsyncpa [#allocation3], 0  ;;  %s472_s0 = inlined_call_operand.vmem [shape: f32[16,32], index: 0, kind: input, shape index: {}]   ;;  %s473_s1 = inlined_call_operand.vmem [shape: f32[16,1], index: 1, kind: input, shape index: {}]   ;;  %s474_s2 = inlined_call_operand.hbm [shape: f32[16,33], index: 2, kind: output, shape index: {}]  }
   0x1   :  { %9 = vsyncpa [#allocation3 + $0x1], 0  ;;  %s384_s9 = smov 0   ;;  %s386_s10 = smov 0  }
   0x2   :  { %s388_s11 = smov 0   ;;  %s390_s12 = smov 0  }
   0x3 LB: > { %s405_s13 = sadd.s32 4294967295, %s366_s12   ;;  %s253_s14 = sadd.s32 4294967294, %s366_s12   ;;  %s366_s12 = sphi %s390_s12, %s480_s12   ;;  %s362_s11 = sphi %s388_s11, %s479_s11   ;;  %s358_s10 = sphi %s386_s10, %s478_s10   ;;  %s354_s9 = sphi %s384_s9, %s477_s9  }
   0x4   : > { %s409_s15 = sadd.s32 1, %s366_s12   ;;  %s74_s16 = sadd.s32 1, %s362_s11 }
   0x5   : > { %s71_s17 = ssub.s32 %s366_s12, %s409_s15  ;;  %p84_p0 = scmp.ne.s32.totalorder %s362_s11, %s358_s10 }
   0x6   : > { %p72_p1 = scmp.eq.s32.totalorder %s71_s17, 0  ;;  %p85_p2 = scmp.eq.s32.totalorder %s405_s13, 1 }
   0x7   : > { %p90_p3 = scmp.ne.s32.totalorder %s358_s10, %s354_s9  ;;  %p91_p4 = scmp.eq.s32.totalorder %s253_s14, 1 }
   0x8   : > { %s420_s18 = scalar_select %p72_p1, %s362_s11, %s74_s16  }
   0x9   : > { %p422_p5 = por %p85_p2, %p84_p0  ;;  %p426_p6 = por %p91_p4, %p90_p3 }
   0xa   : > { %p256_p7 = scmp.ge.s32.totalorder %s366_s12, 1  ;;  %p123_p8 = scmp.lt.s32.totalorder %s366_s12, 3 }
   0xc   : > { %p124_p9 = pnand %p256_p7, %p123_p8 }
   0xd   : > { %p148_p10 = scmp.lt.s32.totalorder (!%p124_p9), %s405_s13, 1  ;;  %s368_s26 = smov (!%p124_p9), 32  }
   0xe   : > { %127 = sbr.rel (%p124_p9) target bundleno = 142 (0x8e), region = 28  ;;  %s145_s27 = sand.u32 (!%p124_p9), 1, %s358_s10  }
   0xf   : > { %s257_s3 = sshll.u32 (!%p124_p9), %s145_s27, 3  ;;  %s261_s5 = sshll.u32 (!%p124_p9), %s405_s13, 3 }
  0x10   : > { %s147_s4 = scalar_lea.vmem (!%p124_p9), [#allocation2], %s257_s3  ;;  %s177_s8 = scalar_lea.hbm (!%p124_p9), %s474_s2, %s261_s5 }
  0x11   : > { %s179_s14 = sshll.u32 (!%p124_p9), %s147_s4, 4  ;;  %s181_s16 = sshll.u32 (!%p124_p9), %s177_s8, 4  ;;  %s180_s14 = int_to_ptr.vmem [resolvable:$true] %s179_s14  ;;  %s182_s16 = int_to_ptr.hbm [resolvable:$true] %s181_s16 }
  0x12   : > { %s167_s17 = scalar_lea.sflag (!%p124_p9), [#allocation3], %s145_s27  ;;  %s324_s24 = scalar_lea.hbm (!%p124_p9), %s474_s2, 16 }
  0x13   : > { %s149_s21 = scalar_select %p148_p10, %s405_s13, 1  ;;  %vm157_vm0 = vcmask 261120   ;;  %vm164_vm1 = vcmask 269568  }
  0x15   : > { %s258_s22 = sshll.u32 %s149_s21, 3  ;;  %s318_s21 = sshra.s32 %s182_s16, 4  ;;  %s319_s21 = int_to_ptr.hbm [resolvable:$true] %s318_s21 }
  0x16   : > { %s155_s25 = scalar_lea.vmem %s473_s1, %s258_s22  ;;  %s151_s30 = scalar_lea.vmem %s472_s0, %s258_s22 }
  0x17   : > { %v159_v0 = vld [vmem:[%s155_s25] sm:$0xff]  ;;  %s320_s22 = scalar_lea.hbm %s319_s21, 8  ;;  %p325_p0 = scmp.lt.s32.totalorder %s319_s21, %s474_s2 }
  0x18   : > { %161 = vrot.lane.b32.xlu0 %v159_v0, %s368_s26  ;;  %v156_v1 = vld [vmem:[%s151_s30] sm:$0xff]  ;;  %p321_p11 = scmp.ne.s32.totalorder %s319_s21, %s320_s22  ;;  %p326_p1 = scmp.lt.s32.totalorder %s324_s24, %s320_s22 }
  0x19   : > { %158 = vst.msk [vmem:[%s147_s4] sm:$0xff] %vm157_vm0, %v156_v1 }
  0x1a   : > { %p322_p12 = pnand %p321_p11, %p422_p5  ;;  %p327_p2 = por %p326_p1, %p325_p0 }
  0x1c   : > { %p323_p13 = pneg %p322_p12 }
  0x1e   : > { %p328_p3 = pnand %p327_p2, %p323_p13 }
  0x8a   : > { %v162_v2 = vpop.permute.xlu0 %161 }
  0x8b   : > { %165 = vst.msk [vmem:[%s147_s4] sm:$0xff] %vm164_vm1, %v162_v2 }
  0x8c   : > { %331 = shalt.err (!%p328_p3)
}
  0x8d   : > { %264 = dma.vmem_to_hbm [thread:$0]  (%p422_p5), %s180_s14, 128, %s182_s16, %s167_s17  }
  0x8e PF: > { %p270_p4 = scmp.ge.s32.totalorder %s366_s12, 2  ;;  %s193_s27 = sand.u32 1, %s354_s9  }
  0x8f   : > { %s194_s28 = scalar_lea.sflag [#allocation3], %s193_s27 }
  0x90   : > { %p267_p7 = pnand %p270_p4, %p426_p6 }
  0x92   : > { %p268_p8 = pneg %p267_p7 }
  0x94   : > { %349 = dma.done.wait (%p268_p8), %s194_s28, 128  }
  0x95   : > { %351 = vsyncadd (%p268_p8), %s194_s28, 4294967168  ;;  %p12_p9 = scmp.ge.s32.totalorder %s409_s15, 4   ;;  %s477_s9 = smov %s358_s10 }
  0x96   : > { %s478_s10 = smov %s362_s11  ;;  %s479_s11 = smov %s420_s18 }
  0x97   : > { %s480_s12 = smov %s409_s15  ;;  %14 = sbr.rel (!%p12_p9) target bundleno = 3 (0x3), region = 66 }
  0x9c   :  { %200 = vsyncpa [#allocation3], 1 }
  0x9d   :  { %202 = vsyncpa [#allocation3 + $0x1], 1 }

</bundles_post_ra>
